<compile_context>
chip_gen: v7x
topology: tpu7x:2x2x1
jax: 0.10.0
libtpu: 0.0.40
codegen_flags: <defaults>
</compile_context>

<pallas_src>
import functools
import math

import jax
import jax.numpy as jnp
from jax import lax
from jax.experimental import pallas as pl
from jax.experimental.pallas import tpu as pltpu


def lsrnn_kernel(
    x_ref,          # (b_tile*L, Din)   batch-major flattened input tile
    wemb_ref,       # (Din, E)
    w1_ref,         # (E, 4H)
    b1_ref,         # (1, 4H)
    w2_ref,         # (4H, 2H)
    b2_ref,         # (1, 2H)
    init_re_ref,    # (1, H)
    init_im_ref,    # (1, H)
    wr1_ref,        # (2H, 2H)
    br1_ref,        # (1, 2H)
    wr2_ref,        # (2H, O_pad)  (zero-padded to lane-dense width)
    br2_ref,        # (1, O_pad)
    out_ref,        # (b_tile, O_pad)
    *,
    seq_len,
):
    rows, _ = x_ref.shape
    H = init_re_ref.shape[1]
    L = seq_len
    b_tile = rows // L

    # --- embedding + A_generator MLP: one big (rows x features) MXU path ---
    x = x_ref[...]
    emb = jnp.dot(x, wemb_ref[...], preferred_element_type=jnp.float32)
    h1 = jnp.maximum(
        jnp.dot(emb, w1_ref[...], preferred_element_type=jnp.float32) + b1_ref[...],
        0.0,
    )
    tri = jnp.dot(h1, w2_ref[...], preferred_element_type=jnp.float32) + b2_ref[...]

    # --- split real/imag and normalize to unit magnitude (rsqrt on the EUP) ---
    re = tri[:, :H]
    im = tri[:, H:]
    # TODO(synk): the PyTorch module divides by |z| with no epsilon; we match it.
    inv_mag = lax.rsqrt(re * re + im * im)
    re = re * inv_mag
    im = im * inv_mag

    # (b_tile, L, H) view for the time-axis product; L is a multiple of 8 so
    # this reshape stays sublane-tile aligned.
    re = re.reshape(b_tile, L, H)
    im = im.reshape(b_tile, L, H)

    # --- final state = h0 * prod_t A_t (complex mult is commutative/assoc.) ---
    # Pairwise tree reduction over time: log2(L) pure-VALU steps, state kept in
    # values (no VMEM scratch, no per-step load/store round trips).
    acc_re = jnp.broadcast_to(init_re_ref[...], (b_tile, H))
    acc_im = jnp.broadcast_to(init_im_ref[...], (b_tile, H))
    n = L
    while n > 1:
        if n % 2 == 1:
            lr = re[:, n - 1, :]
            li = im[:, n - 1, :]
            acc_re, acc_im = (acc_re * lr - acc_im * li,
                              acc_re * li + acc_im * lr)
            n -= 1
        half = n // 2
        a_re, a_im = re[:, :half, :], im[:, :half, :]
        b_re, b_im = re[:, half:n, :], im[:, half:n, :]
        re = a_re * b_re - a_im * b_im
        im = a_re * b_im + a_im * b_re
        n = half
    pr = re[:, 0, :]
    pi = im[:, 0, :]
    hr = acc_re * pr - acc_im * pi
    hi = acc_re * pi + acc_im * pr

    # --- readout MLP on cat(real, imag) of the final hidden state ---
    feat = jnp.concatenate([hr, hi], axis=-1)                       # (b_tile, 2H)
    r1 = jnp.maximum(
        jnp.dot(feat, wr1_ref[...], preferred_element_type=jnp.float32)
        + br1_ref[...],
        0.0,
    )
    out_ref[...] = (
        jnp.dot(r1, wr2_ref[...], preferred_element_type=jnp.float32) + br2_ref[...]
    )


def lsrnn_forward(x, params, *, b_tile=None):
    """x: (B, L, input_size) float32 -> (B, output_size) float32."""
    B, L, Din = x.shape
    E = params["wemb"].shape[1]
    H = params["init_re"].shape[-1]
    O = params["wr2"].shape[-1]
    O_pad = 128 * pl.cdiv(O, 128)          # lane-dense output stores

    if b_tile is None:
        b_tile = 8 if (B % 8 == 0) else B
    assert B % b_tile == 0, "batch must be divisible by b_tile"
    # out block sublane dim must be a multiple of 8 or the full batch
    assert (b_tile % 8 == 0) or (b_tile == B)
    rows = b_tile * L
    assert (rows % 8 == 0) or (b_tile == B)
    grid = (B // b_tile,)

    # Flatten outside the kernel (free layout plumbing in XLA).
    x2 = x.reshape(B * L, Din)

    # Zero-pad the readout layer so the kernel's output write is lane-dense.
    wr2 = jnp.zeros((params["wr2"].shape[0], O_pad), jnp.float32)
    wr2 = wr2.at[:, :O].set(params["wr2"])
    br2 = jnp.zeros((1, O_pad), jnp.float32).at[:, :O].set(params["br2"])

    weight_args = [
        params["wemb"],
        params["w1"], params["b1"],
        params["w2"], params["b2"],
        params["init_re"], params["init_im"],
        params["wr1"], params["br1"],
        wr2, br2,
    ]

    def full_spec(a):
        nd = a.ndim
        return pl.BlockSpec(a.shape, lambda g, _n=nd: (0,) * _n)

    in_specs = [pl.BlockSpec((rows, Din), lambda g: (g, 0))]
    in_specs += [full_spec(a) for a in weight_args]
    out_specs = pl.BlockSpec((b_tile, O_pad), lambda g: (g, 0))

    # VMEM budget: double-buffered x/out tiles + weights + working set, 2x headroom.
    f32 = 4
    weight_bytes = sum(int(a.size) for a in weight_args) * f32
    tile_bytes = 2 * (rows * Din + b_tile * O_pad) * f32
    work_bytes = rows * (E + 4 * H + 2 * H + 6 * H) * f32
    est = 2 * (tile_bytes + 2 * weight_bytes + work_bytes)
    vmem_limit = int(min(64 * 1024 * 1024, max(est, 16 * 1024 * 1024)))

    out = pl.pallas_call(
        functools.partial(lsrnn_kernel, seq_len=L),
        out_shape=jax.ShapeDtypeStruct((B, O_pad), jnp.float32),
        grid=grid,
        in_specs=in_specs,
        out_specs=out_specs,
        compiler_params=pltpu.CompilerParams(
            dimension_semantics=("parallel",),
            vmem_limit_bytes=vmem_limit,
        ),
    )(x2, *weight_args)
    return out[:, :O]


def lsrnn_reference(x, params):
    """Pure-JAX reference mirroring the PyTorch forward (sequential recurrence)."""
    H = params["init_re"].shape[-1]
    emb = x @ params["wemb"]
    h1 = jnp.maximum(emb @ params["w1"] + params["b1"][0], 0.0)
    tri = h1 @ params["w2"] + params["b2"][0]
    re, im = tri[..., :H], tri[..., H:]
    mag = jnp.sqrt(re * re + im * im)
    re, im = re / mag, im / mag

    B, L, _ = x.shape
    hr = jnp.broadcast_to(params["init_re"], (B, H))
    hi = jnp.broadcast_to(params["init_im"], (B, H))
    for i in range(L):
        a, b = re[:, i, :], im[:, i, :]
        hr, hi = a * hr - b * hi, a * hi + b * hr
    feat = jnp.concatenate([hr, hi], axis=-1)
    r1 = jnp.maximum(feat @ params["wr1"] + params["br1"][0], 0.0)
    return r1 @ params["wr2"] + params["br2"][0]


def make_params(key, input_size, embed_size, state_size, output_size):
    H = state_size
    ks = jax.random.split(key, 10)

    def lin_w(k, fan_in, fan_out):
        bound = 1.0 / math.sqrt(fan_in)
        # stored as (in, out) so the kernel computes y = x @ W + b
        return jax.random.uniform(k, (fan_in, fan_out), jnp.float32, -bound, bound)

    def lin_b(k, fan_in, fan_out):
        bound = 1.0 / math.sqrt(fan_in)
        return jax.random.uniform(k, (1, fan_out), jnp.float32, -bound, bound)

    phases = jax.random.uniform(ks[9], (1, H), jnp.float32, 0.0, 2.0 * math.pi)

    return {
        "wemb": lin_w(ks[0], input_size, embed_size),            # embedding (no bias)
        "w1": lin_w(ks[1], embed_size, 4 * H),
        "b1": lin_b(ks[2], embed_size, 4 * H),
        "w2": lin_w(ks[3], 4 * H, 2 * H),
        "b2": lin_b(ks[4], 4 * H, 2 * H),
        "wr1": lin_w(ks[5], 2 * H, 2 * H),
        "br1": lin_b(ks[6], 2 * H, 2 * H),
        "wr2": lin_w(ks[7], 2 * H, output_size),
        "br2": lin_b(ks[8], 2 * H, output_size),
        "init_re": jnp.cos(phases),   # real/imag of exp(i*phase), unit magnitude
        "init_im": jnp.sin(phases),
    }


if __name__ == "__main__":
    # Small shapes consistent with the module's forward; B chosen so the batch
    # grid has >1 step (b_tile=8 -> grid=(2,)).
    B, L = 16, 8
    input_size, embed_size, state_size, output_size = 16, 32, 32, 8

    key = jax.random.PRNGKey(0)
    kx, kp = jax.random.split(key)
    x = jax.random.normal(kx, (B, L, input_size), jnp.float32)
    params = make_params(kp, input_size, embed_size, state_size, output_size)

    out = lsrnn_forward(x, params, b_tile=8)
    out = jax.block_until_ready(out)

    ref = lsrnn_reference(x, params)
    assert out.shape == (B, output_size)
    assert jnp.allclose(out, ref, atol=1e-3, rtol=1e-3), (
        f"mismatch: max abs err {jnp.max(jnp.abs(out - ref))}"
    )
    print("KERNEL_OK")
</pallas_src>

<mosaic_0001>
module attributes {stable_mosaic.version = 11 : i64} {
  func.func @lsrnn_kernel(%arg0: i32, %arg1: memref<64x16xf32, #tpu.memory_space<vmem>>, %arg2: memref<16x32xf32, #tpu.memory_space<vmem>>, %arg3: memref<32x128xf32, #tpu.memory_space<vmem>>, %arg4: memref<1x128xf32, #tpu.memory_space<vmem>>, %arg5: memref<128x64xf32, #tpu.memory_space<vmem>>, %arg6: memref<1x64xf32, #tpu.memory_space<vmem>>, %arg7: memref<1x32xf32, #tpu.memory_space<vmem>>, %arg8: memref<1x32xf32, #tpu.memory_space<vmem>>, %arg9: memref<64x64xf32, #tpu.memory_space<vmem>>, %arg10: memref<1x64xf32, #tpu.memory_space<vmem>>, %arg11: memref<64x128xf32, #tpu.memory_space<vmem>>, %arg12: memref<1x128xf32, #tpu.memory_space<vmem>>, %arg13: memref<8x128xf32, #tpu.memory_space<vmem>>) attributes {dimension_semantics = [#tpu.dimension_semantics<parallel>], iteration_bounds = array<i64: 2>, scalar_prefetch = 0 : i64, scratch_operands = 0 : i64, tpu.core_type = #tpu.core_type<tc>, window_params = [{transform_indices = @transform_0, window_bounds = array<i64: 64, 16>}, {pipeline_mode = #tpu.pipeline_mode<synchronous>, transform_indices = @transform_1, window_bounds = array<i64: 16, 32>}, {pipeline_mode = #tpu.pipeline_mode<synchronous>, transform_indices = @transform_2, window_bounds = array<i64: 32, 128>}, {pipeline_mode = #tpu.pipeline_mode<synchronous>, transform_indices = @transform_3, window_bounds = array<i64: 1, 128>}, {pipeline_mode = #tpu.pipeline_mode<synchronous>, transform_indices = @transform_4, window_bounds = array<i64: 128, 64>}, {pipeline_mode = #tpu.pipeline_mode<synchronous>, transform_indices = @transform_5, window_bounds = array<i64: 1, 64>}, {pipeline_mode = #tpu.pipeline_mode<synchronous>, transform_indices = @transform_6, window_bounds = array<i64: 1, 32>}, {pipeline_mode = #tpu.pipeline_mode<synchronous>, transform_indices = @transform_7, window_bounds = array<i64: 1, 32>}, {pipeline_mode = #tpu.pipeline_mode<synchronous>, transform_indices = @transform_8, window_bounds = array<i64: 64, 64>}, {pipeline_mode = #tpu.pipeline_mode<synchronous>, transform_indices = @transform_9, window_bounds = array<i64: 1, 64>}, {pipeline_mode = #tpu.pipeline_mode<synchronous>, transform_indices = @transform_10, window_bounds = array<i64: 64, 128>}, {pipeline_mode = #tpu.pipeline_mode<synchronous>, transform_indices = @transform_11, window_bounds = array<i64: 1, 128>}, {transform_indices = @transform_12, window_bounds = array<i64: 8, 128>}]} {
    %c0 = arith.constant 0 : index
    %c0_0 = arith.constant 0 : index
    %0 = vector.load %arg1[%c0, %c0_0] : memref<64x16xf32, #tpu.memory_space<vmem>>, vector<64x16xf32>
    %c0_1 = arith.constant 0 : index
    %c0_2 = arith.constant 0 : index
    %1 = vector.load %arg2[%c0_1, %c0_2] : memref<16x32xf32, #tpu.memory_space<vmem>>, vector<16x32xf32>
    %cst = arith.constant dense<0.000000e+00> : vector<64x32xf32>
    %2 = tpu.matmul %0, %1, %cst {dimension_numbers = #tpu.dot_dimension_numbers<[1], [0], [0], [1], [0, 0, 1, 1], [], []>} : vector<64x16xf32>, vector<16x32xf32>, vector<64x32xf32> -> vector<64x32xf32>
    %c0_3 = arith.constant 0 : index
    %c0_4 = arith.constant 0 : index
    %3 = vector.load %arg3[%c0_3, %c0_4] : memref<32x128xf32, #tpu.memory_space<vmem>>, vector<32x128xf32>
    %cst_5 = arith.constant dense<0.000000e+00> : vector<64x128xf32>
    %4 = tpu.matmul %2, %3, %cst_5 {dimension_numbers = #tpu.dot_dimension_numbers<[1], [0], [0], [1], [0, 0, 1, 1], [], []>} : vector<64x32xf32>, vector<32x128xf32>, vector<64x128xf32> -> vector<64x128xf32>
    %c0_6 = arith.constant 0 : index
    %c0_7 = arith.constant 0 : index
    %5 = vector.load %arg4[%c0_6, %c0_7] : memref<1x128xf32, #tpu.memory_space<vmem>>, vector<1x128xf32>
    %6 = vector.broadcast %5 : vector<1x128xf32> to vector<64x128xf32>
    %7 = arith.addf %4, %6 : vector<64x128xf32>
    %cst_8 = arith.constant 0.000000e+00 : f32
    %8 = vector.broadcast %cst_8 : f32 to vector<64x128xf32>
    %9 = arith.maximumf %7, %8 : vector<64x128xf32>
    %c0_9 = arith.constant 0 : index
    %c0_10 = arith.constant 0 : index
    %10 = vector.load %arg5[%c0_9, %c0_10] : memref<128x64xf32, #tpu.memory_space<vmem>>, vector<128x64xf32>
    %cst_11 = arith.constant dense<0.000000e+00> : vector<64x64xf32>
    %11 = tpu.matmul %9, %10, %cst_11 {dimension_numbers = #tpu.dot_dimension_numbers<[1], [0], [0], [1], [0, 0, 1, 1], [], []>} : vector<64x128xf32>, vector<128x64xf32>, vector<64x64xf32> -> vector<64x64xf32>
    %c0_12 = arith.constant 0 : index
    %c0_13 = arith.constant 0 : index
    %12 = vector.load %arg6[%c0_12, %c0_13] : memref<1x64xf32, #tpu.memory_space<vmem>>, vector<1x64xf32>
    %13 = vector.broadcast %12 : vector<1x64xf32> to vector<64x64xf32>
    %14 = arith.addf %11, %13 : vector<64x64xf32>
    %15 = vector.extract_strided_slice %14 {offsets = [0, 0], sizes = [64, 32], strides = [1, 1]} : vector<64x64xf32> to vector<64x32xf32>
    %16 = vector.extract_strided_slice %14 {offsets = [0, 32], sizes = [64, 32], strides = [1, 1]} : vector<64x64xf32> to vector<64x32xf32>
    %17 = arith.mulf %15, %15 : vector<64x32xf32>
    %18 = arith.mulf %16, %16 : vector<64x32xf32>
    %19 = arith.addf %17, %18 : vector<64x32xf32>
    %20 = math.rsqrt %19 : vector<64x32xf32>
    %21 = arith.mulf %15, %20 : vector<64x32xf32>
    %22 = arith.mulf %16, %20 : vector<64x32xf32>
    %23 = vector.shape_cast %21 : vector<64x32xf32> to vector<8x8x32xf32>
    %24 = vector.shape_cast %22 : vector<64x32xf32> to vector<8x8x32xf32>
    %c0_14 = arith.constant 0 : index
    %c0_15 = arith.constant 0 : index
    %25 = vector.load %arg7[%c0_14, %c0_15] : memref<1x32xf32, #tpu.memory_space<vmem>>, vector<1x32xf32>
    %26 = vector.shape_cast %25 : vector<1x32xf32> to vector<1x32xf32>
    %27 = vector.broadcast %26 : vector<1x32xf32> to vector<8x32xf32>
    %c0_16 = arith.constant 0 : index
    %c0_17 = arith.constant 0 : index
    %28 = vector.load %arg8[%c0_16, %c0_17] : memref<1x32xf32, #tpu.memory_space<vmem>>, vector<1x32xf32>
    %29 = vector.shape_cast %28 : vector<1x32xf32> to vector<1x32xf32>
    %30 = vector.broadcast %29 : vector<1x32xf32> to vector<8x32xf32>
    %31 = vector.extract_strided_slice %23 {offsets = [0, 0, 0], sizes = [8, 4, 32], strides = [1, 1, 1]} : vector<8x8x32xf32> to vector<8x4x32xf32>
    %32 = vector.extract_strided_slice %24 {offsets = [0, 0, 0], sizes = [8, 4, 32], strides = [1, 1, 1]} : vector<8x8x32xf32> to vector<8x4x32xf32>
    %33 = vector.extract_strided_slice %23 {offsets = [0, 4, 0], sizes = [8, 4, 32], strides = [1, 1, 1]} : vector<8x8x32xf32> to vector<8x4x32xf32>
    %34 = vector.extract_strided_slice %24 {offsets = [0, 4, 0], sizes = [8, 4, 32], strides = [1, 1, 1]} : vector<8x8x32xf32> to vector<8x4x32xf32>
    %35 = arith.mulf %31, %33 : vector<8x4x32xf32>
    %36 = arith.mulf %32, %34 : vector<8x4x32xf32>
    %37 = arith.subf %35, %36 : vector<8x4x32xf32>
    %38 = arith.mulf %31, %34 : vector<8x4x32xf32>
    %39 = arith.mulf %32, %33 : vector<8x4x32xf32>
    %40 = arith.addf %38, %39 : vector<8x4x32xf32>
    %41 = vector.extract_strided_slice %37 {offsets = [0, 0, 0], sizes = [8, 2, 32], strides = [1, 1, 1]} : vector<8x4x32xf32> to vector<8x2x32xf32>
    %42 = vector.extract_strided_slice %40 {offsets = [0, 0, 0], sizes = [8, 2, 32], strides = [1, 1, 1]} : vector<8x4x32xf32> to vector<8x2x32xf32>
    %43 = vector.extract_strided_slice %37 {offsets = [0, 2, 0], sizes = [8, 2, 32], strides = [1, 1, 1]} : vector<8x4x32xf32> to vector<8x2x32xf32>
    %44 = vector.extract_strided_slice %40 {offsets = [0, 2, 0], sizes = [8, 2, 32], strides = [1, 1, 1]} : vector<8x4x32xf32> to vector<8x2x32xf32>
    %45 = arith.mulf %41, %43 : vector<8x2x32xf32>
    %46 = arith.mulf %42, %44 : vector<8x2x32xf32>
    %47 = arith.subf %45, %46 : vector<8x2x32xf32>
    %48 = arith.mulf %41, %44 : vector<8x2x32xf32>
    %49 = arith.mulf %42, %43 : vector<8x2x32xf32>
    %50 = arith.addf %48, %49 : vector<8x2x32xf32>
    %51 = vector.extract_strided_slice %47 {offsets = [0, 0, 0], sizes = [8, 1, 32], strides = [1, 1, 1]} : vector<8x2x32xf32> to vector<8x1x32xf32>
    %52 = vector.extract_strided_slice %50 {offsets = [0, 0, 0], sizes = [8, 1, 32], strides = [1, 1, 1]} : vector<8x2x32xf32> to vector<8x1x32xf32>
    %53 = vector.extract_strided_slice %47 {offsets = [0, 1, 0], sizes = [8, 1, 32], strides = [1, 1, 1]} : vector<8x2x32xf32> to vector<8x1x32xf32>
    %54 = vector.extract_strided_slice %50 {offsets = [0, 1, 0], sizes = [8, 1, 32], strides = [1, 1, 1]} : vector<8x2x32xf32> to vector<8x1x32xf32>
    %55 = arith.mulf %51, %53 : vector<8x1x32xf32>
    %56 = arith.mulf %52, %54 : vector<8x1x32xf32>
    %57 = arith.subf %55, %56 : vector<8x1x32xf32>
    %58 = arith.mulf %51, %54 : vector<8x1x32xf32>
    %59 = arith.mulf %52, %53 : vector<8x1x32xf32>
    %60 = arith.addf %58, %59 : vector<8x1x32xf32>
    %61 = vector.shape_cast %57 : vector<8x1x32xf32> to vector<8x32xf32>
    %62 = vector.shape_cast %60 : vector<8x1x32xf32> to vector<8x32xf32>
    %63 = arith.mulf %27, %61 : vector<8x32xf32>
    %64 = arith.mulf %30, %62 : vector<8x32xf32>
    %65 = arith.subf %63, %64 : vector<8x32xf32>
    %66 = arith.mulf %27, %62 : vector<8x32xf32>
    %67 = arith.mulf %30, %61 : vector<8x32xf32>
    %68 = arith.addf %66, %67 : vector<8x32xf32>
    %69 = tpu.concatenate %65, %68 in 1 : vector<8x32xf32>, vector<8x32xf32> -> vector<8x64xf32>
    %c0_18 = arith.constant 0 : index
    %c0_19 = arith.constant 0 : index
    %70 = vector.load %arg9[%c0_18, %c0_19] : memref<64x64xf32, #tpu.memory_space<vmem>>, vector<64x64xf32>
    %cst_20 = arith.constant dense<0.000000e+00> : vector<8x64xf32>
    %71 = tpu.matmul %69, %70, %cst_20 {dimension_numbers = #tpu.dot_dimension_numbers<[1], [0], [0], [1], [0, 0, 1, 1], [], []>} : vector<8x64xf32>, vector<64x64xf32>, vector<8x64xf32> -> vector<8x64xf32>
    %c0_21 = arith.constant 0 : index
    %c0_22 = arith.constant 0 : index
    %72 = vector.load %arg10[%c0_21, %c0_22] : memref<1x64xf32, #tpu.memory_space<vmem>>, vector<1x64xf32>
    %73 = vector.broadcast %72 : vector<1x64xf32> to vector<8x64xf32>
    %74 = arith.addf %71, %73 : vector<8x64xf32>
    %cst_23 = arith.constant 0.000000e+00 : f32
    %75 = vector.broadcast %cst_23 : f32 to vector<8x64xf32>
    %76 = arith.maximumf %74, %75 : vector<8x64xf32>
    %c0_24 = arith.constant 0 : index
    %c0_25 = arith.constant 0 : index
    %77 = vector.load %arg11[%c0_24, %c0_25] : memref<64x128xf32, #tpu.memory_space<vmem>>, vector<64x128xf32>
    %cst_26 = arith.constant dense<0.000000e+00> : vector<8x128xf32>
    %78 = tpu.matmul %76, %77, %cst_26 {dimension_numbers = #tpu.dot_dimension_numbers<[1], [0], [0], [1], [0, 0, 1, 1], [], []>} : vector<8x64xf32>, vector<64x128xf32>, vector<8x128xf32> -> vector<8x128xf32>
    %c0_27 = arith.constant 0 : index
    %c0_28 = arith.constant 0 : index
    %79 = vector.load %arg12[%c0_27, %c0_28] : memref<1x128xf32, #tpu.memory_space<vmem>>, vector<1x128xf32>
    %80 = vector.broadcast %79 : vector<1x128xf32> to vector<8x128xf32>
    %81 = arith.addf %78, %80 : vector<8x128xf32>
    %c0_29 = arith.constant 0 : index
    %c0_30 = arith.constant 0 : index
    %82 = vector.load %arg13[%c0_29, %c0_30] : memref<8x128xf32, #tpu.memory_space<vmem>>, vector<8x128xf32>
    tpu.vector_store %arg13[%c0_29, %c0_30], %81 {strides = array<i32>} : memref<8x128xf32, #tpu.memory_space<vmem>>, vector<8x128xf32>,
    return
  }
  func.func @transform_0(%arg0: i32) -> (i32, i32) {
    %c0_i32 = arith.constant 0 : i32
    %c0_i32_0 = arith.constant 0 : i32
    return %arg0, %c0_i32 : i32, i32
  }
  func.func @transform_1(%arg0: i32) -> (i32, i32) {
    %c0_i32 = arith.constant 0 : i32
    %c0_i32_0 = arith.constant 0 : i32
    %c0_i32_1 = arith.constant 0 : i32
    return %c0_i32, %c0_i32_0 : i32, i32
  }
  func.func @transform_2(%arg0: i32) -> (i32, i32) {
    %c0_i32 = arith.constant 0 : i32
    %c0_i32_0 = arith.constant 0 : i32
    %c0_i32_1 = arith.constant 0 : i32
    return %c0_i32, %c0_i32_0 : i32, i32
  }
  func.func @transform_3(%arg0: i32) -> (i32, i32) {
    %c0_i32 = arith.constant 0 : i32
    %c0_i32_0 = arith.constant 0 : i32
    %c0_i32_1 = arith.constant 0 : i32
    return %c0_i32, %c0_i32_0 : i32, i32
  }
  func.func @transform_4(%arg0: i32) -> (i32, i32) {
    %c0_i32 = arith.constant 0 : i32
    %c0_i32_0 = arith.constant 0 : i32
    %c0_i32_1 = arith.constant 0 : i32
    return %c0_i32, %c0_i32_0 : i32, i32
  }
  func.func @transform_5(%arg0: i32) -> (i32, i32) {
    %c0_i32 = arith.constant 0 : i32
    %c0_i32_0 = arith.constant 0 : i32
    %c0_i32_1 = arith.constant 0 : i32
    return %c0_i32, %c0_i32_0 : i32, i32
  }
  func.func @transform_6(%arg0: i32) -> (i32, i32) {
    %c0_i32 = arith.constant 0 : i32
    %c0_i32_0 = arith.constant 0 : i32
    %c0_i32_1 = arith.constant 0 : i32
    return %c0_i32, %c0_i32_0 : i32, i32
  }
  func.func @transform_7(%arg0: i32) -> (i32, i32) {
    %c0_i32 = arith.constant 0 : i32
    %c0_i32_0 = arith.constant 0 : i32
    %c0_i32_1 = arith.constant 0 : i32
    return %c0_i32, %c0_i32_0 : i32, i32
  }
  func.func @transform_8(%arg0: i32) -> (i32, i32) {
    %c0_i32 = arith.constant 0 : i32
    %c0_i32_0 = arith.constant 0 : i32
    %c0_i32_1 = arith.constant 0 : i32
    return %c0_i32, %c0_i32_0 : i32, i32
  }
  func.func @transform_9(%arg0: i32) -> (i32, i32) {
    %c0_i32 = arith.constant 0 : i32
    %c0_i32_0 = arith.constant 0 : i32
    %c0_i32_1 = arith.constant 0 : i32
    return %c0_i32, %c0_i32_0 : i32, i32
  }
  func.func @transform_10(%arg0: i32) -> (i32, i32) {
    %c0_i32 = arith.constant 0 : i32
    %c0_i32_0 = arith.constant 0 : i32
    %c0_i32_1 = arith.constant 0 : i32
    return %c0_i32, %c0_i32_0 : i32, i32
  }
  func.func @transform_11(%arg0: i32) -> (i32, i32) {
    %c0_i32 = arith.constant 0 : i32
    %c0_i32_0 = arith.constant 0 : i32
    %c0_i32_1 = arith.constant 0 : i32
    return %c0_i32, %c0_i32_0 : i32, i32
  }
  func.func @transform_12(%arg0: i32) -> (i32, i32) {
    %c0_i32 = arith.constant 0 : i32
    %c0_i32_0 = arith.constant 0 : i32
    return %arg0, %c0_i32 : i32, i32
  }
}

</mosaic_0001>

<bundles_post_ra>
// kernel: tpu_custom_call.1
= control target key start
LH: loop header
LB: loop body
LE: loop exit
PB: predicated region body
PF: predicated region fallthrough
CT: control target
= control target key end

     0   :  { %17 = vsyncpa [#allocation3], 0  ;;  %s2593_s0 = inlined_call_operand.vmem [shape: f32[128,16], index: 0, kind: input, shape index: {}]   ;;  %s2594_s1 = inlined_call_operand.vmem [shape: f32[16,32], index: 1, kind: input, shape index: {}]   ;;  %s2595_s2 = inlined_call_operand.vmem [shape: f32[32,128], index: 2, kind: input, shape index: {}]   ;;  %s2596_s3 = inlined_call_operand.vmem [shape: f32[1,128], index: 3, kind: input, shape index: {}]   ;;  %s2597_s4 = inlined_call_operand.vmem [shape: f32[128,64], index: 4, kind: input, shape index: {}]   ;;  %s2598_s5 = inlined_call_operand.vmem [shape: f32[1,64], index: 5, kind: input, shape index: {}]   ;;  %s2599_s6 = inlined_call_operand.vmem [shape: f32[1,32], index: 6, kind: input, shape index: {}]   ;;  %s2600_s7 = inlined_call_operand.vmem [shape: f32[1,32], index: 7, kind: input, shape index: {}]   ;;  %s2601_s8 = inlined_call_operand.vmem [shape: f32[64,64], index: 8, kind: input, shape index: {}]   ;;  %s2602_s9 = inlined_call_operand.vmem [shape: f32[1,64], index: 9, kind: input, shape index: {}]   ;;  %s2603_s10 = inlined_call_operand.vmem [shape: f32[64,128], index: 10, kind: input, shape index: {}]   ;;  %s2604_s11 = inlined_call_operand.vmem [shape: f32[1,128], index: 11, kind: input, shape index: {}]   ;;  %s2605_s12 = inlined_call_operand.hbm [shape: f32[16,128], index: 12, kind: output, shape index: {}]  }
   0x1   :  { %19 = vsyncpa [#allocation3 + $0x1], 0  ;;  %s2145_s21 = smov 0   ;;  %s2147_s22 = smov 0  }
   0x2   :  { %s2149_s23 = smov 0   ;;  %s2151_s24 = smov 0  }
   0x3 LB: > { %2607 = sst [smem:[#allocation5_spill]] %s2068_s23  ;;  %s2166_s25 = sadd.s32 4294967295, %s2072_s24   ;;  %s2072_s24 = sphi %s2151_s24, %s2615_s24   ;;  %s2068_s23 = sphi %s2149_s23, %s2612_s23   ;;  %s2064_s22 = sphi %s2147_s22, %s2614_s22   ;;  %s2060_s21 = sphi %s2145_s21, %s2613_s21  }
   0x4   : > { %s1665_s26 = sadd.s32 4294967294, %s2072_s24   ;;  %s2170_s27 = sadd.s32 1, %s2072_s24  }
   0x5   : > { %s289_s28 = sadd.s32 1, %s2068_s23  ;;  %s286_s29 = ssub.s32 %s2072_s24, %s2170_s27 }
   0x6   : > { %p299_p0 = scmp.ne.s32.totalorder %s2068_s23, %s2064_s22  ;;  %p287_p1 = scmp.eq.s32.totalorder %s286_s29, 0 }
   0x7   : > { %p300_p2 = scmp.eq.s32.totalorder %s2166_s25, 1  ;;  %p305_p3 = scmp.ne.s32.totalorder %s2064_s22, %s2060_s21 }
   0x8   : > { %p306_p4 = scmp.eq.s32.totalorder %s1665_s26, 1  ;;  %p1668_p7 = scmp.ge.s32.totalorder %s2072_s24, 1 }
   0x9   : > { %s2181_s30 = scalar_select %p287_p1, %s2068_s23, %s289_s28  }
   0xa   : > { %p2183_p5 = por %p300_p2, %p299_p0  ;;  %p2187_p6 = por %p306_p4, %p305_p3 }
   0xb   : > { %2608 = sst [smem:[#allocation6_spill]] %s2181_s30  ;;  %p366_p8 = scmp.lt.s32.totalorder %s2072_s24, 3 }
   0xd   : > { %p367_p9 = pnand %p1668_p7, %p366_p8 }
   0xe   : > { %v422_v0 = vld [vmem:[%s2594_s1] sm:$0xff] (!%p367_p9)  ;;  %v423_v1 = vld [vmem:[%s2594_s1 + $0x8] sm:$0xff] (!%p367_p9)  ;;  %s1670_s19 = sshll.u32 (!%p367_p9), %s2166_s25, 3  ;;  %v556_v5 = vld [vmem:[%s2595_s2 + $0x10] sm:$0xff] (!%p367_p9)  ;;  %vm424_vm0 = vcmask (!%p367_p9), 130048   ;;  %vm565_vm1 = vcmask (!%p367_p9), 261120  }
   0xf   : > { %370 = sbr.rel (%p367_p9) target bundleno = 1667 (0x683), region = 68  ;;  %v554_v2 = vld [vmem:[%s2595_s2] sm:$0xff] (!%p367_p9)  ;;  %v1882_v3 = vpack.c.bf16 (!%p367_p9), %v423_v1, %v422_v0  ;;  %p409_p10 = scmp.lt.s32.totalorder (!%p367_p9), %s1670_s19, 15  ;;  %v555_v4 = vld [vmem:[%s2595_s2 + $0x8] sm:$0xff] (!%p367_p9)  ;;  %v557_v6 = vld [vmem:[%s2595_s2 + $0x18] sm:$0xff] (!%p367_p9)  ;;  %vm1358_vm2 = vcmask (!%p367_p9), 1041409  }
  0x10   : > { %v1886_v7 = vpack.c.bf16 (!%p367_p9), %v555_v4, %v554_v2  ;;  %v1890_v8 = vpack.c.bf16 (!%p367_p9), %v557_v6, %v556_v5  ;;  %v703_v17 = vld [vmem:[%s2597_s4] sm:$0xff] (!%p367_p9)  ;;  %v704_v18 = vld [vmem:[%s2597_s4 + $0x8] sm:$0xff] (!%p367_p9)  ;;  %v705_v19 = vld [vmem:[%s2597_s4 + $0x10] sm:$0xff] (!%p367_p9)  ;;  %s2074_s28 = smov (!%p367_p9), 96   ;;  %s2075_s29 = smov (!%p367_p9), 32   ;;  %vm1361_vm3 = vcmask (!%p367_p9), 1042434  }
  0x11   : > { %1883 = vmatprep.subr.bf16.mxu0 (!%p367_p9), %v1882_v3  ;;  %v1894_v20 = vpack.c.bf16 (!%p367_p9), %v704_v18, %v703_v17  ;;  %v706_v21 = vld [vmem:[%s2597_s4 + $0x18] sm:$0xff] (!%p367_p9)  ;;  %v707_v23 = vld [vmem:[%s2597_s4 + $0x20] sm:$0xff] (!%p367_p9)  ;;  %v708_v24 = vld [vmem:[%s2597_s4 + $0x28] sm:$0xff] (!%p367_p9)  ;;  %vm1364_vm4 = vcmask (!%p367_p9), 1043459   ;;  %vm1367_vm5 = vcmask (!%p367_p9), 1044484   ;;  %vm1370_vm6 = vcmask (!%p367_p9), 1045509  }
  0x12   : > { %1885 = vmatpush3.bf16.msra.mxu0 (!%p367_p9), %v1882_v3  ;;  %1887 = vmatprep.subr.bf16.mxu1 (!%p367_p9), %v1886_v7  ;;  %v1898_v22 = vpack.c.bf16 (!%p367_p9), %v706_v21, %v705_v19  ;;  %v1902_v25 = vpack.c.bf16 (!%p367_p9), %v708_v24, %v707_v23  ;;  %v709_v26 = vld [vmem:[%s2597_s4 + $0x30] sm:$0xff] (!%p367_p9)  ;;  %v710_v27 = vld [vmem:[%s2597_s4 + $0x38] sm:$0xff] (!%p367_p9)  ;;  %v711_v29 = vld [vmem:[%s2597_s4 + $0x40] sm:$0xff] (!%p367_p9)  ;;  %vm1373_vm7 = vcmask (!%p367_p9), 1046534   ;;  %vm2077_vm8 = vmmov (!%p367_p9), 0   ;;  %s405_s30 = sand.u32 (!%p367_p9), 1, %s2064_s22  }
  0x13   : > { %1889 = vmatpush3.bf16.msra.mxu1 (!%p367_p9), %v1886_v7  ;;  %1895 = vmatprep.subr.bf16.mxu0 (!%p367_p9), %v1894_v20  ;;  %v1906_v28 = vpack.c.bf16 (!%p367_p9), %v710_v27, %v709_v26  ;;  %v712_v30 = vld [vmem:[%s2597_s4 + $0x48] sm:$0xff] (!%p367_p9)  ;;  %v713_v32 = vld [vmem:[%s2597_s4 + $0x50] sm:$0xff] (!%p367_p9)  ;;  %v714_v33 = vld [vmem:[%s2597_s4 + $0x58] sm:$0xff] (!%p367_p9)  ;;  %vm1376_vm9 = vcmask (!%p367_p9), 1047559   ;;  %vm1428_vm10 = vcmask (!%p367_p9), 523264   ;;  %s1697_s15 = sshll.u32 (!%p367_p9), %s2166_s25, 7 }
  0x14   : > { %1891 = vmatprep.subr.bf16.mxu1 (!%p367_p9), %v1890_v8  ;;  %v1910_v31 = vpack.c.bf16 (!%p367_p9), %v712_v30, %v711_v29  ;;  %v1914_v34 = vpack.c.bf16 (!%p367_p9), %v714_v33, %v713_v32  ;;  %v715_v35 = vld [vmem:[%s2597_s4 + $0x60] sm:$0xff] (!%p367_p9)  ;;  %v716_v36 = vld [vmem:[%s2597_s4 + $0x68] sm:$0xff] (!%p367_p9)  ;;  %v717_v46 = vld [vmem:[%s2597_s4 + $0x70] sm:$0xff] (!%p367_p9)  ;;  %s1593_s23 = scalar_lea.sflag (!%p367_p9), [#allocation3], %s405_s30  ;;  %s2079_s25 = smov (!%p367_p9), [#allocation2]  }
  0x15   : > { %v1918_v37 = vpack.c.bf16 (!%p367_p9), %v716_v36, %v715_v35  ;;  %v718_v47 = vld [vmem:[%s2597_s4 + $0x78] sm:$0xff] (!%p367_p9)  ;;  %v1680_v49 = vld [vmem:[%s2596_s3] ss:$0 sm:$0xff] (!%p367_p9) }
  0x16   : > { %s2617_s19 = smov (!%p409_p10, %s1670_s19), 15  ;;  %v1922_v48 = vpack.c.bf16 %v718_v47, %v717_v46 }
  0x17   : > { %s1671_s17 = sshll.u32 %s2617_s19, 3  ;;  %1893 = vmatpush3.bf16.msra.mxu1 %v1890_v8 }
  0x18   : > { %s412_s26 = scalar_lea.vmem %s2593_s0, %s1671_s17 }
  0x19   : > { %v414_v9 = vld [vmem:[%s412_s26] sm:$0xff]  ;;  %v415_v10 = vld [vmem:[%s412_s26 + $0x8] sm:$0xff]  ;;  %v416_v11 = vld [vmem:[%s412_s26 + $0x10] sm:$0xff] }
  0x1a   : > { %1768 = vmatprep.mubr.msk.f32.mxu0 %vm424_vm0, %v414_v9  ;;  %v417_v12 = vld [vmem:[%s412_s26 + $0x18] sm:$0xff]  ;;  %v418_v13 = vld [vmem:[%s412_s26 + $0x20] sm:$0xff]  ;;  %v419_v14 = vld [vmem:[%s412_s26 + $0x28] sm:$0xff] }
  0x1b   : > { %1769 = vmatmul.mubr.msk.f32.vlgmr.msra.gmra.mrb[0].mxu0 %vm424_vm0, %v415_v10  ;;  %v420_v15 = vld [vmem:[%s412_s26 + $0x30] sm:$0xff]  ;;  %v421_v16 = vld [vmem:[%s412_s26 + $0x38] sm:$0xff]  ;;  %v1689_v10 = vld [vmem:[%s2598_s5] ss:$0 sm:$0xff]  ;;  %s2551_s26 = scalar_lea.hbm %s2605_s12, %s1697_s15 }
  0x1c   : > { %1771 = vmatprep.mubr.msk.f32.mxu0 %vm424_vm0, %v416_v11  ;;  %1897 = vmatpush3.bf16.msra.mxu0 %v1894_v20 }
  0x1d   : > { %1899 = vmatprep.subr.bf16.mxu0 %v1898_v22 }
  0x1f   : > { %1772 = vmatmul.mubr.msk.f32.gmra.mrb[2].mxu0 %vm424_vm0, %v417_v12 }
  0x20   : > { %1774 = vmatprep.mubr.msk.f32.mxu0 %vm424_vm0, %v418_v13  ;;  %1901 = vmatpush3.bf16.msra.mxu0 %v1898_v22 }
  0x21   : > { %1903 = vmatprep.subr.bf16.mxu0 %v1902_v25 }
  0x23   : > { %1775 = vmatmul.mubr.msk.f32.gmra.mrb[4].mxu0 %vm424_vm0, %v419_v14 }
  0x24   : > { %1777 = vmatprep.mubr.msk.f32.mxu0 %vm424_vm0, %v420_v15  ;;  %1905 = vmatpush3.bf16.msra.mxu0 %v1902_v25 }
  0x25   : > { %1907 = vmatprep.subr.bf16.mxu0 %v1906_v28 }
  0x27   : > { %1778 = vmatmul.mubr.msk.f32.gmra.mrb[6].mxu0 %vm424_vm0, %v421_v16 }
  0x28   : > { %1909 = vmatpush3.bf16.msra.mxu0 %v1906_v28 }
  0x29   : > { %1911 = vmatprep.subr.bf16.mxu0 %v1910_v31 }
  0x2c   : > { %1913 = vmatpush3.bf16.msra.mxu0 %v1910_v31 }
  0x2d   : > { %1915 = vmatprep.subr.bf16.mxu0 %v1914_v34 }
  0x30   : > { %1917 = vmatpush3.bf16.msra.mxu0 %v1914_v34 }
  0x31   : > { %1919 = vmatprep.subr.bf16.mxu0 %v1918_v37 }
  0x34   : > { %1921 = vmatpush3.bf16.msra.mxu0 %v1918_v37 }
  0x35   : > { %1923 = vmatprep.subr.bf16.mxu0 %v1922_v48 }
  0x38   : > { %1925 = vmatpush3.bf16.msra.mxu0 %v1922_v48 }
  0xee   : > { %v1770_v38 = vpop.f32.mrb[0].mxu0 }
  0xef   : > { %v515_v39 = vpop.f32.mrb[1].mxu0 }
  0xf0   : > { %1788 = vmatprep.mubr.msk.f32.mxu1 %vm565_vm1, %v515_v39 }
  0xf1   : > { %1789 = vmatmul.mubr.msk.f32.vlgmr.msra.gmra.mrb[0].mxu1 %vm565_vm1, %v1770_v38 }
  0xf2   : > { %v1773_v40 = vpop.f32.mrb[2].mxu0 }
  0xf3   : > { %v525_v41 = vpop.f32.mrb[3].mxu0 }
  0xf4   : > { %1791 = vmatprep.mubr.msk.f32.mxu1 %vm565_vm1, %v525_v41 }
  0xf5   : > { %1792 = vmatmul.mubr.msk.f32.gmra.mrb[2].mxu1 %vm565_vm1, %v1773_v40 }
  0xf6   : > { %v1776_v42 = vpop.f32.mrb[4].mxu0 }
  0xf7   : > { %v535_v43 = vpop.f32.mrb[5].mxu0 }
  0xf8   : > { %1794 = vmatprep.mubr.msk.f32.mxu1 %vm565_vm1, %v535_v43 }
  0xf9   : > { %1795 = vmatmul.mubr.msk.f32.gmra.mrb[4].mxu1 %vm565_vm1, %v1776_v42 }
  0xfa   : > { %v1779_v44 = vpop.f32.mrb[6].mxu0 }
  0xfb   : > { %v545_v45 = vpop.f32.mrb[7].mxu0 }
  0xfc   : > { %1797 = vmatprep.mubr.msk.f32.mxu1 %vm565_vm1, %v545_v45 }
  0xfd   : > { %1798 = vmatmul.mubr.msk.f32.gmra.mrb[6].mxu1 %vm565_vm1, %v1779_v44 }
 0x1c4   : > { %v1790_v50 = vpop.f32.mrb[0].mxu1 }
 0x1c5   : > { %v662_v51 = vadd.f32 %v1790_v50, %v1680_v49  ;;  %v656_v52 = vpop.f32.mrb[1].mxu1 }
 0x1c6   : > { %v657_v53 = vadd.f32 %v1680_v49, %v656_v52 }
 0x1c7   : > { %v696_v56 = vmax.f32 %v662_v51, 0.0 }
 0x1c8   : > { %v695_v54 = vmax.f32 %v657_v53, 0.0  ;;  %v1793_v55 = vpop.f32.mrb[2].mxu1 }
 0x1c9   : > { %v672_v57 = vadd.f32 %v1793_v55, %v1680_v49  ;;  %v666_v58 = vpop.f32.mrb[3].mxu1 }
 0x1ca   : > { %v667_v59 = vadd.f32 %v1680_v49, %v666_v58  ;;  %1832 = vmatprep.mubr.f32.mxu0 %v695_v54 }
 0x1cb   : > { %v698_v60 = vmax.f32 %v672_v57, 0.0  ;;  %1833 = vmatmul.mubr.f32.vlgmr.msra.gmra.mrb[8].mxu0 %v696_v56 }
 0x1cc   : > { %v697_v61 = vmax.f32 %v667_v59, 0.0  ;;  %v1796_v62 = vpop.f32.mrb[4].mxu1 }
 0x1cd   : > { %v682_v63 = vadd.f32 %v1796_v62, %v1680_v49  ;;  %v676_v0 = vpop.f32.mrb[5].mxu1 }
 0x1ce   : > { %v677_v1 = vadd.f32 %v1680_v49, %v676_v0  ;;  %1835 = vmatprep.mubr.f32.mxu0 %v697_v61 }
 0x1cf   : > { %v700_v2 = vmax.f32 %v682_v63, 0.0  ;;  %1836 = vmatmul.mubr.f32.gmra.mrb[10].mxu0 %v698_v60 }
 0x1d0   : > { %v699_v3 = vmax.f32 %v677_v1, 0.0  ;;  %v1799_v4 = vpop.f32.mrb[6].mxu1 }
 0x1d1   : > { %v692_v5 = vadd.f32 %v1799_v4, %v1680_v49  ;;  %v686_v6 = vpop.f32.mrb[7].mxu1 }
 0x1d2   : > { %v687_v7 = vadd.f32 %v1680_v49, %v686_v6  ;;  %1838 = vmatprep.mubr.f32.mxu0 %v699_v3 }
 0x1d3   : > { %v702_v8 = vmax.f32 %v692_v5, 0.0  ;;  %1839 = vmatmul.mubr.f32.gmra.mrb[12].mxu0 %v700_v2 }
 0x1d4   : > { %v701_v9 = vmax.f32 %v687_v7, 0.0 }
 0x1d6   : > { %1841 = vmatprep.mubr.f32.mxu0 %v701_v9 }
 0x1d7   : > { %1842 = vmatmul.mubr.f32.gmra.mrb[14].mxu0 %v702_v8 }
 0x29e   : > { %v1834_v11 = vpop.f32.mrb[8].mxu0 }
 0x29f   : > { %v2285_v12 = vadd.f32 %v1834_v11, %v1689_v10  ;;  %v792_v13 = vpop.f32.mrb[9].mxu0 }
 0x2a0   : > { %v2287_v14 = vadd.f32 %v1689_v10, %v792_v13 }
 0x2a1   : > { %v832_v15 = vmul.f32 %v2285_v12, %v2285_v12 }
 0x2a2   : > { %v1837_v16 = vpop.f32.mrb[10].mxu0  ;;  %v831_v17 = vmul.f32 %v2287_v14, %v2287_v14 }
 0x2a3   : > { %v2293_v18 = vadd.f32 %v1837_v16, %v1689_v10  ;;  %849 = vrot.lane.b32.xlu0 %v832_v15, %s2074_s28  ;;  %v802_v19 = vpop.f32.mrb[11].mxu0 }
 0x2a4   : > { %v2296_v20 = vadd.f32 %v1689_v10, %v802_v19  ;;  %847 = vrot.lane.b32.xlu1 %v831_v17, %s2074_s28 }
 0x2a5   : > { %v834_v21 = vmul.f32 %v2293_v18, %v2293_v18 }
 0x2a6   : > { %v1840_v22 = vpop.f32.mrb[12].mxu0  ;;  %v833_v23 = vmul.f32 %v2296_v20, %v2296_v20 }
 0x2a7   : > { %v2303_v24 = vadd.f32 %v1840_v22, %v1689_v10  ;;  %v812_v25 = vpop.f32.mrb[13].mxu0 }
 0x2a8   : > { %v2305_v26 = vadd.f32 %v1689_v10, %v812_v25  ;;  %851 = vrot.lane.b32.xlu0 %v833_v23, %s2074_s28  ;;  %853 = vrot.lane.b32.xlu1 %v834_v21, %s2074_s28 }
 0x2a9   : > { %v836_v27 = vmul.f32 %v2303_v24, %v2303_v24 }
 0x2aa   : > { %v1843_v28 = vpop.f32.mrb[14].mxu0  ;;  %v835_v29 = vmul.f32 %v2305_v26, %v2305_v26 }
 0x2ab   : > { %v2313_v30 = vadd.f32 %v1843_v28, %v1689_v10  ;;  %v822_v31 = vpop.f32.mrb[15].mxu0 }
 0x2ac   : > { %v2315_v32 = vadd.f32 %v1689_v10, %v822_v31  ;;  %855 = vrot.lane.b32.xlu0 %v835_v29, %s2074_s28  ;;  %857 = vrot.lane.b32.xlu1 %v836_v27, %s2074_s28 }
 0x2ad   : > { %v838_v33 = vmul.f32 %v2313_v30, %v2313_v30 }
 0x2ae   : > { %v837_v34 = vmul.f32 %v2315_v32, %v2315_v32 }
 0x2b0   : > { %861 = vrot.lane.b32.xlu1 %v838_v33, %s2074_s28  ;;  %859 = vrot.lane.b32.xlu0 %v837_v34, %s2074_s28 }
 0x315   : > { %v850_v35 = vpop.permute.xlu0 %849 }
 0x316   : > { %v872_v36 = vadd.f32 %v850_v35, %v832_v15  ;;  %v848_v37 = vpop.permute.xlu1 %847 }
 0x317   : > { %v871_v38 = vadd.f32 %v848_v37, %v831_v17 }
 0x318   : > { %1994 = vrsqrt.f32 %v872_v36 }
 0x319   : > { %1996 = vrsqrt.f32 %v871_v38 }
 0x31a   : > { %v852_v39 = vpop.permute.xlu0 %851  ;;  %v854_v40 = vpop.permute.xlu1 %853 }
 0x31b   : > { %v874_v41 = vadd.f32 %v854_v40, %v834_v21  ;;  %v873_v42 = vadd.f32 %v852_v39, %v833_v23 }
 0x31d   : > { %1998 = vrsqrt.f32 %v874_v41 }
 0x31e   : > { %v856_v43 = vpop.permute.xlu0 %855  ;;  %v858_v44 = vpop.permute.xlu1 %857  ;;  %2000 = vrsqrt.f32 %v873_v42 }
 0x31f   : > { %v876_v46 = vadd.f32 %v858_v44, %v836_v27  ;;  %v875_v47 = vadd.f32 %v856_v43, %v835_v29 }
 0x321   : > { %2002 = vrsqrt.f32 %v876_v46 }
 0x322   : > { %v1995_v45 = vpop.eup %1994  ;;  %v860_v48 = vpop.permute.xlu0 %859  ;;  %2004 = vrsqrt.f32 %v875_v47 }
 0x323   : > { %905 = vrot.lane.b32.xlu0 %v1995_v45, %s2075_s29  ;;  %v2327_v49 = vmul.f32 %v1995_v45, %v2285_v12  ;;  %v1997_v50 = vpop.eup %1996  ;;  %v862_v51 = vpop.permute.xlu1 %861  ;;  %v877_v53 = vadd.f32 %v860_v48, %v837_v34 }
 0x324   : > { %v2333_v55 = vmul.f32 %v1997_v50, %v2287_v14  ;;  %v878_v56 = vadd.f32 %v862_v51, %v838_v33 }
 0x325   : > { %v958_v54 = vrot.slane %v2327_v49, 4  ;;  %2006 = vrsqrt.f32 %v877_v53 }
 0x326   : > { %v957_v58 = vrot.slane %v2333_v55, 4  ;;  %2008 = vrsqrt.f32 %v878_v56 }
 0x327   : > { %903 = vrot.lane.b32.xlu0 %v1997_v50, %s2075_s29  ;;  %v1999_v52 = vpop.eup %1998 }
 0x328   : > { %909 = vrot.lane.b32.xlu1 %v1999_v52, %s2075_s29  ;;  %v2001_v57 = vpop.eup %2000  ;;  %v2344_v59 = vmul.f32 %v1999_v52, %v2293_v18 }
 0x329   : > { %v2348_v61 = vmul.f32 %v2001_v57, %v2296_v20 }
 0x32a   : > { %v960_v63 = vrot.slane %v2344_v59, 4 }
 0x32b   : > { %1087 = vrot.lane.b32.xlu0 %v958_v54, %s2075_s29  ;;  %v2003_v60 = vpop.eup %2002  ;;  %v959_v0 = vrot.slane %v2348_v61, 4 }
 0x32c   : > { %907 = vrot.lane.b32.xlu1 %v2001_v57, %s2075_s29  ;;  %v2005_v62 = vpop.eup %2004  ;;  %v2371_v6 = vmul.f32 %v2003_v60, %v2303_v24 }
 0x32d   : > { %v2357_v1 = vmul.f32 %v2005_v62, %v2305_v26 }
 0x32e   : > { %v962_v8 = vrot.slane %v2371_v6, 4 }
 0x32f   : > { %1085 = vrot.lane.b32.xlu0 %v957_v58, %s2075_s29  ;;  %v2007_v2 = vpop.eup %2006  ;;  %v961_v4 = vrot.slane %v2357_v1, 4 }
 0x330   : > { %913 = vrot.lane.b32.xlu1 %v2003_v60, %s2075_s29  ;;  %v2009_v3 = vpop.eup %2008  ;;  %v2365_v5 = vmul.f32 %v2007_v2, %v2315_v32 }
 0x331   : > { %v2380_v9 = vmul.f32 %v2009_v3, %v2313_v30 }
 0x332   : > { %v963_v7 = vrot.slane %v2365_v5, 4 }
 0x333   : > { %911 = vrot.lane.b32.xlu0 %v2005_v62, %s2075_s29  ;;  %v964_v10 = vrot.slane %v2380_v9, 4 }
 0x334   : > { %1091 = vrot.lane.b32.xlu1 %v960_v63, %s2075_s29 }
 0x337   : > { %1089 = vrot.lane.b32.xlu0 %v959_v0, %s2075_s29 }
 0x338   : > { %917 = vrot.lane.b32.xlu1 %v2009_v3, %s2075_s29 }
 0x33b   : > { %1093 = vrot.lane.b32.xlu0 %v961_v4, %s2075_s29 }
 0x33c   : > { %915 = vrot.lane.b32.xlu1 %v2007_v2, %s2075_s29 }
 0x33f   : > { %1097 = vrot.lane.b32.xlu0 %v963_v7, %s2075_s29 }
 0x340   : > { %1095 = vrot.lane.b32.xlu1 %v962_v8, %s2075_s29 }
 0x344   : > { %1099 = vrot.lane.b32.xlu1 %v964_v10, %s2075_s29 }
 0x395   : > { %v906_v11 = vpop.permute.xlu0 %905 }
 0x396   : > { %v928_v13 = vmul.f32 %v906_v11, %v2285_v12  ;;  %v1413_v11 = vld [vmem:[%s2601_s8] sm:$0xff] }
 0x398   : > { %v990_v15 = vrot.slane %v928_v13, 4 }
 0x399   : > { %v904_v16 = vpop.permute.xlu0 %903 }
 0x39a   : > { %v927_v17 = vmul.f32 %v904_v16, %v2287_v14  ;;  %1055 = vrot.lane.b32.xlu0 %v990_v15, %s2074_s28  ;;  %v910_v19 = vpop.permute.xlu1 %909  ;;  %v1006_v21 = vmul.f32 %v990_v15, %v928_v13  ;;  %v1415_v15 = vld [vmem:[%s2601_s8 + $0x10] sm:$0xff]  ;;  %v2076_v16 = vmov 0.0|0.0  }
 0x39b   : > { %v930_v29 = vmul.f32 %v910_v19, %v2293_v18  ;;  %1926 = vmatprep.subr.bf16.mxu1 %v2076_v16  ;;  %v1416_v19 = vld [vmem:[%s2601_s8 + $0x18] sm:$0xff] }
 0x39c   : > { %v989_v22 = vrot.slane %v927_v17, 4 }
 0x39d   : > { %v1088_v23 = vpop.permute.xlu0 %1087  ;;  %v992_v34 = vrot.slane %v930_v29, 4 }
 0x39e   : > { %1023 = vrot.lane.b32.xlu0 %v1006_v21, %s2074_s28  ;;  %1053 = vrot.lane.b32.xlu1 %v989_v22, %s2074_s28  ;;  %v908_v25 = vpop.permute.xlu1 %907  ;;  %v1110_v27 = vmul.f32 %v1088_v23, %v928_v13  ;;  %v1005_v33 = vmul.f32 %v989_v22, %v927_v17  ;;  %v1414_v13 = vld [vmem:[%s2601_s8 + $0x8] sm:$0xff]  ;;  %v1930_v21 = vpack.c.bf16 %v1416_v19, %v1415_v15  ;;  %v1417_v22 = vld [vmem:[%s2601_s8 + $0x20] sm:$0xff] }
 0x39f   : > { %v929_v14 = vmul.f32 %v908_v25, %v2296_v20  ;;  %v1008_v18 = vmul.f32 %v992_v34, %v930_v29  ;;  %v1418_v23 = vld [vmem:[%s2601_s8 + $0x28] sm:$0xff] }
 0x3a0   : > { %v1933_v25 = vpack.c.bf16 %v1418_v23, %v1417_v22  ;;  %v975_v22 = vmul.f32 %v959_v0, %v2348_v61 }
 0x3a1   : > { %v1086_v28 = vpop.permute.xlu0 %1085  ;;  %v991_v36 = vrot.slane %v929_v14, 4 }
 0x3a2   : > { %v1109_v12 = vmul.f32 %v1086_v28, %v927_v17  ;;  %1127 = vrot.lane.b32.xlu1 %v1110_v27, %s2074_s28  ;;  %v914_v31 = vpop.permute.xlu1 %913  ;;  %v1927_v17 = vpack.c.bf16 %v1414_v13, %v1413_v11  ;;  %v1419_v27 = vld [vmem:[%s2601_s8 + $0x30] sm:$0xff]  ;;  %v1420_v28 = vld [vmem:[%s2601_s8 + $0x38] sm:$0xff] }
 0x3a3   : > { %v932_v38 = vmul.f32 %v914_v31, %v2303_v24  ;;  %v1007_v41 = vmul.f32 %v991_v36, %v929_v14  ;;  %v974_v31 = vmul.f32 %v958_v54, %v2327_v49 }
 0x3a4   : > { %1125 = vrot.lane.b32.xlu0 %v1109_v12, %s2074_s28  ;;  %1928 = vmatpush3.bf16.msra.mxu1 %v1927_v17 }
 0x3a5   : > { %v912_v37 = vpop.permute.xlu0 %911  ;;  %v994_v43 = vrot.slane %v932_v38, 4  ;;  %1929 = vmatprep.subr.bf16.mxu1 %v2076_v16 }
 0x3a6   : > { %1021 = vrot.lane.b32.xlu1 %v1005_v33, %s2074_s28  ;;  %v1092_v35 = vpop.permute.xlu1 %1091  ;;  %v931_v40 = vmul.f32 %v912_v37, %v2305_v26 }
 0x3a7   : > { %v1112_v39 = vmul.f32 %v1092_v35, %v930_v29  ;;  %v1010_v26 = vmul.f32 %v994_v43, %v932_v38  ;;  %v1936_v29 = vpack.c.bf16 %v1420_v28, %v1419_v27 }
 0x3a8   : > { %1059 = vrot.lane.b32.xlu0 %v992_v34, %s2074_s28  ;;  %v993_v45 = vrot.slane %v931_v40, 4  ;;  %1931 = vmatpush3.bf16.msra.mxu1 %v1930_v21 }
 0x3a9   : > { %v1090_v42 = vpop.permute.xlu0 %1089  ;;  %1932 = vmatprep.subr.bf16.mxu1 %v2076_v16 }
 0x3aa   : > { %1057 = vrot.lane.b32.xlu1 %v991_v36, %s2074_s28  ;;  %v918_v20 = vpop.permute.xlu1 %917  ;;  %v1111_v44 = vmul.f32 %v1090_v42, %v929_v14  ;;  %v1009_v24 = vmul.f32 %v993_v45, %v931_v40 }
 0x3ab   : > { %v934_v50 = vmul.f32 %v918_v20, %v2313_v30 }
 0x3ac   : > { %1027 = vrot.lane.b32.xlu0 %v1008_v18, %s2074_s28  ;;  %1934 = vmatpush3.bf16.msra.mxu1 %v1933_v25 }
 0x3ad   : > { %v1094_v47 = vpop.permute.xlu0 %1093  ;;  %v996_v56 = vrot.slane %v934_v50, 4  ;;  %1935 = vmatprep.subr.bf16.mxu1 %v2076_v16 }
 0x3ae   : > { %1131 = vrot.lane.b32.xlu1 %v1112_v39, %s2074_s28  ;;  %v916_v46 = vpop.permute.xlu1 %915  ;;  %v1113_v51 = vmul.f32 %v1094_v47, %v931_v40 }
 0x3af   : > { %v933_v52 = vmul.f32 %v916_v46, %v2315_v32  ;;  %v1012_v32 = vmul.f32 %v996_v56, %v934_v50 }
 0x3b0   : > { %1025 = vrot.lane.b32.xlu0 %v1007_v41, %s2074_s28  ;;  %1937 = vmatpush3.bf16.msra.mxu1 %v1936_v29  ;;  %v973_v41 = vmul.f32 %v957_v58, %v2333_v55  ;;  %v976_v58 = vmul.f32 %v960_v63, %v2344_v59 }
 0x3b1   : > { %v995_v57 = vrot.slane %v933_v52, 4  ;;  %v1098_v60 = vpop.permute.xlu0 %1097  ;;  %1938 = vmatprep.subr.bf16.mxu1 %v2076_v16 }
 0x3b2   : > { %1063 = vrot.lane.b32.xlu1 %v994_v43, %s2074_s28  ;;  %v1096_v48 = vpop.permute.xlu1 %1095  ;;  %v1115_v2 = vmul.f32 %v1098_v60, %v933_v52 }
 0x3b3   : > { %v1114_v53 = vmul.f32 %v1096_v48, %v932_v38  ;;  %v1011_v62 = vmul.f32 %v995_v57, %v933_v52 }
 0x3b4   : > { %1129 = vrot.lane.b32.xlu0 %v1111_v44, %s2074_s28 }
 0x3b6   : > { %1061 = vrot.lane.b32.xlu1 %v993_v45, %s2074_s28  ;;  %v1100_v30 = vpop.permute.xlu1 %1099 }
 0x3b7   : > { %v1116_v3 = vmul.f32 %v1100_v30, %v934_v50 }
 0x3b8   : > { %1029 = vrot.lane.b32.xlu0 %v1009_v24, %s2074_s28 }
 0x3ba   : > { %1031 = vrot.lane.b32.xlu1 %v1010_v26, %s2074_s28 }
 0x3bc   : > { %1133 = vrot.lane.b32.xlu0 %v1113_v51, %s2074_s28 }
 0x3be   : > { %1135 = vrot.lane.b32.xlu1 %v1114_v53, %s2074_s28 }
 0x3c0   : > { %1067 = vrot.lane.b32.xlu0 %v996_v56, %s2074_s28 }
 0x3c2   : > { %1065 = vrot.lane.b32.xlu1 %v995_v57, %s2074_s28 }
 0x3c4   : > { %1033 = vrot.lane.b32.xlu0 %v1011_v62, %s2074_s28 }
 0x3c6   : > { %1137 = vrot.lane.b32.xlu1 %v1115_v2, %s2074_s28 }
 0x3c8   : > { %1035 = vrot.lane.b32.xlu0 %v1012_v32, %s2074_s28 }
 0x3ca   : > { %1139 = vrot.lane.b32.xlu1 %v1116_v3, %s2074_s28 }
 0x40c   : > { %v1056_v12 = vpop.permute.xlu0 %1055 }
 0x40d   : > { %v1078_v35 = vmul.f32 %v1056_v12, %v2327_v49 }
 0x410   : > { %v1054_v14 = vpop.permute.xlu1 %1053  ;;  %v1024_v33 = vpop.permute.xlu0 %1023 }
 0x411   : > { %v1046_v34 = vsub.f32 %v974_v31, %v1024_v33  ;;  %v1077_v18 = vmul.f32 %v1054_v14, %v2333_v55 }
 0x413   : > { %v1166_v36 = vrot.slane %v1046_v34, 2 }
 0x414   : > { %v1128_v37 = vpop.permute.xlu1 %1127 }
 0x415   : > { %v1150_v38 = vadd.f32 %v1128_v37, %v1078_v35  ;;  %v1182_v42 = vmul.f32 %v1166_v36, %v1046_v34 }
 0x416   : > { %v1126_v39 = vpop.permute.xlu0 %1125 }
 0x417   : > { %v1198_v20 = vrot.slane %v1150_v38, 2  ;;  %v1149_v40 = vadd.f32 %v1126_v39, %v1077_v18  ;;  %v1238_v45 = vmul.f32 %v1166_v36, %v1150_v38 }
 0x418   : > { %v1022_v43 = vpop.permute.xlu1 %1021 }
 0x419   : > { %v1214_v54 = vmul.f32 %v1198_v20, %v1150_v38  ;;  %v1230_v44 = vmul.f32 %v1198_v20, %v1046_v34  ;;  %v1045_v46 = vsub.f32 %v973_v41, %v1022_v43  ;;  %v1197_v24 = vrot.slane %v1149_v40, 2 }
 0x41a   : > { %v1060_v49 = vpop.permute.xlu0 %1059 }
 0x41b   : > { %v1222_v47 = vsub.f32 %v1182_v42, %v1214_v54  ;;  %v1246_v26 = vadd.f32 %v1238_v45, %v1230_v44  ;;  %v1165_v48 = vrot.slane %v1045_v46, 2  ;;  %v1213_v57 = vmul.f32 %v1197_v24, %v1149_v40 }
 0x41c   : > { %v1058_v50 = vpop.permute.xlu1 %1057  ;;  %v1229_v60 = vmul.f32 %v1197_v24, %v1045_v46  ;;  %v1080_v55 = vmul.f32 %v1060_v49, %v2344_v59 }
 0x41d   : > { %v1262_v51 = vrot.slane %v1222_v47, 1  ;;  %v1294_v52 = vrot.slane %v1246_v26, 1  ;;  %v1181_v53 = vmul.f32 %v1165_v48, %v1045_v46  ;;  %v1237_v56 = vmul.f32 %v1165_v48, %v1149_v40 }
 0x41e   : > { %v1028_v62 = vpop.permute.xlu0 %1027  ;;  %v1079_v63 = vmul.f32 %v1058_v50, %v2348_v61 }
 0x41f   : > { %v1278_v2 = vmul.f32 %v1262_v51, %v1222_v47  ;;  %v1310_v30 = vmul.f32 %v1294_v52, %v1246_v26  ;;  %v1326_v32 = vmul.f32 %v1294_v52, %v1222_v47  ;;  %v1334_v3 = vmul.f32 %v1262_v51, %v1246_v26 }
 0x420   : > { %v1221_v11 = vsub.f32 %v1181_v53, %v1213_v57  ;;  %v1245_v13 = vadd.f32 %v1237_v56, %v1229_v60  ;;  %v1048_v15 = vsub.f32 %v976_v58, %v1028_v62  ;;  %v1132_v17 = vpop.permute.xlu1 %1131  ;;  %v977_v26 = vmul.f32 %v961_v4, %v2357_v1 }
 0x421   : > { %v1318_v19 = vsub.f32 %v1278_v2, %v1310_v30  ;;  %v1152_v21 = vadd.f32 %v1132_v17, %v1080_v55  ;;  %v1342_v23 = vadd.f32 %v1334_v3, %v1326_v32  ;;  %v978_v53 = vmul.f32 %v962_v8, %v2371_v6 }
 0x422   : > { %v1261_v25 = vrot.slane %v1221_v11, 1  ;;  %v1293_v27 = vrot.slane %v1245_v13, 1  ;;  %v1168_v28 = vrot.slane %v1048_v15, 2  ;;  %v1026_v59 = vpop.permute.xlu0 %1025 }
 0x423   : > { %v1200_v29 = vrot.slane %v1152_v21, 2  ;;  %v1047_v12 = vsub.f32 %v975_v22, %v1026_v59  ;;  %v1357_v0 = vrot.slane %v1318_v19, 7  ;;  %v1388_v39 = vrot.slane %v1342_v23, 7 }
 0x424   : > { %v1277_v31 = vmul.f32 %v1261_v25, %v1221_v11  ;;  %v1309_v14 = vmul.f32 %v1293_v27, %v1245_v13  ;;  %v1325_v33 = vmul.f32 %v1293_v27, %v1221_v11  ;;  %v1333_v34 = vmul.f32 %v1261_v25, %v1245_v13  ;;  %v1064_v35 = vpop.permute.xlu1 %1063 }
 0x425   : > { %v1184_v36 = vmul.f32 %v1168_v28, %v1048_v15  ;;  %v1216_v37 = vmul.f32 %v1200_v29, %v1152_v21  ;;  %v1232_v18 = vmul.f32 %v1200_v29, %v1048_v15  ;;  %v1240_v38 = vmul.f32 %v1168_v28, %v1152_v21 }
 0x426   : > { %v1317_v20 = vsub.f32 %v1277_v31, %v1309_v14  ;;  %v1341_v40 = vadd.f32 %v1333_v34, %v1325_v33  ;;  %v1130_v41 = vpop.permute.xlu0 %1129  ;;  %v1167_v54 = vrot.slane %v1047_v12, 2  ;;  %v980_v15 = vmul.f32 %v964_v10, %v2380_v9 }
 0x427   : > { %v1224_v42 = vsub.f32 %v1184_v36, %v1216_v37  ;;  %v1248_v43 = vadd.f32 %v1240_v38, %v1232_v18  ;;  %v1151_v61 = vadd.f32 %v1130_v41, %v1079_v63  ;;  %v1082_v8 = vmul.f32 %v1064_v35, %v2371_v6 }
 0x428   : > { %v2467_v44 = vsel %vm1358_vm2, %v1357_v0, %v1317_v20  ;;  %v2470_v45 = vsel %vm1358_vm2, %v1388_v39, %v1341_v40  ;;  %v1062_v46 = vpop.permute.xlu1 %1061  ;;  %v1183_v51 = vmul.f32 %v1167_v54, %v1047_v12  ;;  %v979_v19 = vmul.f32 %v963_v7, %v2365_v5 }
 0x429   : > { %v1264_v24 = vrot.slane %v1224_v42, 1  ;;  %v1296_v49 = vrot.slane %v1248_v43, 1  ;;  %v1199_v47 = vrot.slane %v1151_v61, 2  ;;  %v1239_v52 = vmul.f32 %v1167_v54, %v1151_v61 }
 0x42a   : > { %v1030_v48 = vpop.permute.xlu0 %1029  ;;  %v1081_v30 = vmul.f32 %v1062_v46, %v2357_v1 }
 0x42b   : > { %v1280_v50 = vmul.f32 %v1264_v24, %v1224_v42  ;;  %v1312_v56 = vmul.f32 %v1296_v49, %v1248_v43  ;;  %v1215_v57 = vmul.f32 %v1199_v47, %v1151_v61  ;;  %v1231_v60 = vmul.f32 %v1199_v47, %v1047_v12 }
 0x42c   : > { %v1049_v55 = vsub.f32 %v977_v26, %v1030_v48  ;;  %v1032_v58 = vpop.permute.xlu1 %1031  ;;  %v1328_v62 = vmul.f32 %v1296_v49, %v1224_v42  ;;  %v1336_v2 = vmul.f32 %v1264_v24, %v1248_v43 }
 0x42d   : > { %v1050_v32 = vsub.f32 %v978_v53, %v1032_v58  ;;  %v1223_v3 = vsub.f32 %v1183_v51, %v1215_v57  ;;  %v1247_v4 = vadd.f32 %v1239_v52, %v1231_v60  ;;  %v1320_v21 = vsub.f32 %v1280_v50, %v1312_v56 }
 0x42e   : > { %v1169_v11 = vrot.slane %v1049_v55, 2  ;;  %v1134_v13 = vpop.permute.xlu0 %1133  ;;  %v2486_v27 = vadd.f32 %v1336_v2, %v1328_v62 }
 0x42f   : > { %v1153_v17 = vadd.f32 %v1134_v13, %v1081_v30  ;;  %v1263_v22 = vrot.slane %v1223_v3, 1  ;;  %v1295_v1 = vrot.slane %v1247_v4, 1  ;;  %v1170_v23 = vrot.slane %v1050_v32, 2 }
 0x430   : > { %v1136_v25 = vpop.permute.xlu1 %1135  ;;  %v1185_v28 = vmul.f32 %v1169_v11, %v1049_v55  ;;  %v1363_v41 = vrot.slane %v1320_v21, 5  ;;  %v1392_v42 = vrot.slane %v2486_v27, 5 }
 0x431   : > { %v1201_v59 = vrot.slane %v1153_v17, 2  ;;  %v1154_v63 = vadd.f32 %v1136_v25, %v1082_v8  ;;  %v1279_v10 = vmul.f32 %v1263_v22, %v1223_v3  ;;  %v1311_v29 = vmul.f32 %v1295_v1, %v1247_v4 }
 0x432   : > { %v1327_v6 = vmul.f32 %v1295_v1, %v1223_v3  ;;  %v1335_v12 = vmul.f32 %v1263_v22, %v1247_v4  ;;  %v1068_v31 = vpop.permute.xlu0 %1067  ;;  %v1241_v7 = vmul.f32 %v1169_v11, %v1153_v17  ;;  %v1186_v37 = vmul.f32 %v1170_v23, %v1050_v32 }
 0x433   : > { %v1217_v14 = vmul.f32 %v1201_v59, %v1153_v17  ;;  %v1233_v33 = vmul.f32 %v1201_v59, %v1049_v55  ;;  %v1202_v34 = vrot.slane %v1154_v63, 2  ;;  %v1319_v35 = vsub.f32 %v1279_v10, %v1311_v29 }
 0x434   : > { %v1343_v36 = vadd.f32 %v1335_v12, %v1327_v6  ;;  %v1242_v18 = vmul.f32 %v1170_v23, %v1154_v63  ;;  %v1066_v38 = vpop.permute.xlu1 %1065  ;;  %v1084_v21 = vmul.f32 %v1068_v31, %v2380_v9 }
 0x435   : > { %v1225_v0 = vsub.f32 %v1185_v28, %v1217_v14  ;;  %v1249_v39 = vadd.f32 %v1241_v7, %v1233_v33  ;;  %v1218_v20 = vmul.f32 %v1202_v34, %v1154_v63  ;;  %v1234_v40 = vmul.f32 %v1202_v34, %v1050_v32 }
 0x436   : > { %v1360_v43 = vrot.slane %v1319_v35, 6  ;;  %v1390_v54 = vrot.slane %v1343_v36, 6  ;;  %v1034_v61 = vpop.permute.xlu0 %1033  ;;  %v1083_v26 = vmul.f32 %v1066_v38, %v2365_v5 }
 0x437   : > { %v1265_v46 = vrot.slane %v1225_v0, 1  ;;  %v1297_v24 = vrot.slane %v1249_v39, 1  ;;  %v1226_v49 = vsub.f32 %v1186_v37, %v1218_v20  ;;  %v1250_v47 = vadd.f32 %v1242_v18, %v1234_v40 }
 0x438   : > { %v1051_v48 = vsub.f32 %v979_v19, %v1034_v61  ;;  %v1138_v50 = vpop.permute.xlu1 %1137  ;;  %v1362_v51 = vsel %vm1361_vm3, %v1360_v43, %v2467_v44  ;;  %v1391_v52 = vsel %vm1361_vm3, %v1390_v54, %v2470_v45 }
 0x439   : > { %v1281_v53 = vmul.f32 %v1265_v46, %v1225_v0  ;;  %v1313_v56 = vmul.f32 %v1297_v24, %v1249_v39  ;;  %v1329_v57 = vmul.f32 %v1297_v24, %v1225_v0  ;;  %v1337_v60 = vmul.f32 %v1265_v46, %v1249_v39 }
 0x43a   : > { %v1266_v55 = vrot.slane %v1226_v49, 1  ;;  %v1298_v58 = vrot.slane %v1250_v47, 1  ;;  %v1171_v62 = vrot.slane %v1051_v48, 2  ;;  %v1155_v2 = vadd.f32 %v1138_v50, %v1083_v26  ;;  %v1036_v30 = vpop.permute.xlu0 %1035 }
 0x43b   : > { %v1321_v32 = vsub.f32 %v1281_v53, %v1313_v56  ;;  %v1345_v3 = vadd.f32 %v1337_v60, %v1329_v57  ;;  %v1052_v5 = vsub.f32 %v980_v15, %v1036_v30  ;;  %v1365_v4 = vsel %vm1364_vm4, %v1363_v41, %v1362_v51 }
 0x43c   : > { %v1282_v11 = vmul.f32 %v1266_v55, %v1226_v49  ;;  %v1314_v13 = vmul.f32 %v1298_v58, %v1250_v47  ;;  %v1330_v44 = vmul.f32 %v1298_v58, %v1226_v49  ;;  %v1338_v8 = vmul.f32 %v1266_v55, %v1250_v47  ;;  %v1140_v17 = vpop.permute.xlu1 %1139  ;;  %v1690_v55 = vld [vmem:[%s2599_s6] ss:$0 sm:$0xff] }
 0x43d   : > { %v1366_v45 = vrot.slane %v1321_v32, 4  ;;  %v1394_v19 = vrot.slane %v1345_v3, 4  ;;  %v1203_v22 = vrot.slane %v1155_v2, 2  ;;  %v1187_v25 = vmul.f32 %v1171_v62, %v1051_v48  ;;  %v1691_v58 = vld [vmem:[%s2600_s7] ss:$0 sm:$0xff] }
 0x43e   : > { %v1322_v1 = vsub.f32 %v1282_v11, %v1314_v13  ;;  %v1346_v23 = vadd.f32 %v1338_v8, %v1330_v44  ;;  %v1243_v27 = vmul.f32 %v1171_v62, %v1155_v2  ;;  %v1156_v63 = vadd.f32 %v1140_v17, %v1084_v21  ;;  %v1503_v8 = vld [vmem:[%s2603_s10] sm:$0xff]  ;;  %v1504_v17 = vld [vmem:[%s2603_s10 + $0x8] sm:$0xff]  ;;  %v1505_v21 = vld [vmem:[%s2603_s10 + $0x10] sm:$0xff] }
 0x43f   : > { %v1219_v28 = vmul.f32 %v1203_v22, %v1155_v2  ;;  %v1235_v59 = vmul.f32 %v1203_v22, %v1051_v48  ;;  %v1368_v15 = vsel %vm1367_vm5, %v1366_v45, %v1365_v4  ;;  %v1172_v6 = vrot.slane %v1052_v5, 2  ;;  %v1506_v22 = vld [vmem:[%s2603_s10 + $0x18] sm:$0xff] }
 0x440   : > { %v1369_v10 = vrot.slane %v1322_v1, 3  ;;  %v1396_v29 = vrot.slane %v1346_v23, 3  ;;  %v1393_v12 = vsel %vm1364_vm4, %v1392_v42, %v1391_v52  ;;  %v1204_v7 = vrot.slane %v1156_v63, 2 }
 0x441   : > { %v1227_v14 = vsub.f32 %v1187_v25, %v1219_v28  ;;  %v1251_v33 = vadd.f32 %v1243_v27, %v1235_v59  ;;  %v1395_v31 = vsel %vm1367_vm5, %v1394_v19, %v1393_v12  ;;  %v1188_v18 = vmul.f32 %v1172_v6, %v1052_v5  ;;  %v1507_v25 = vld [vmem:[%s2603_s10 + $0x20] sm:$0xff]  ;;  %v1508_v27 = vld [vmem:[%s2603_s10 + $0x28] sm:$0xff]  ;;  %v1509_v59 = vld [vmem:[%s2603_s10 + $0x30] sm:$0xff] }
 0x442   : > { %v1371_v9 = vsel %vm1370_vm6, %v1369_v10, %v1368_v15  ;;  %v1220_v36 = vmul.f32 %v1204_v7, %v1156_v63  ;;  %v1236_v37 = vmul.f32 %v1204_v7, %v1052_v5  ;;  %v1244_v38 = vmul.f32 %v1172_v6, %v1156_v63  ;;  %v1510_v63 = vld [vmem:[%s2603_s10 + $0x38] sm:$0xff]  ;;  %v1692_v10 = vld [vmem:[%s2602_s9] ss:$0 sm:$0xff] }
 0x443   : > { %v1267_v34 = vrot.slane %v1227_v14, 1  ;;  %v1299_v35 = vrot.slane %v1251_v33, 1  ;;  %v1397_v0 = vsel %vm1370_vm6, %v1396_v29, %v1395_v31  ;;  %v2078_v26 = vmov 0.0  }
 0x444   : > { %v1228_v42 = vsub.f32 %v1188_v18, %v1220_v36  ;;  %v1252_v43 = vadd.f32 %v1244_v38, %v1236_v37  ;;  %1860 = vmatprep.mubr.msk.f32.mxu1 %vm2077_vm8, %v2078_v26  ;;  %v1939_v45 = vpack.c.bf16 %v1504_v17, %v1503_v8  ;;  %v1942_v23 = vpack.c.bf16 %v1506_v22, %v1505_v21 }
 0x445   : > { %v1283_v39 = vmul.f32 %v1267_v34, %v1227_v14  ;;  %v1315_v20 = vmul.f32 %v1299_v35, %v1251_v33  ;;  %v1331_v40 = vmul.f32 %v1299_v35, %v1227_v14  ;;  %v1339_v41 = vmul.f32 %v1267_v34, %v1251_v33 }
 0x446   : > { %v1268_v46 = vrot.slane %v1228_v42, 1  ;;  %v1300_v24 = vrot.slane %v1252_v43, 1  ;;  %v1945_v28 = vpack.c.bf16 %v1508_v27, %v1507_v25  ;;  %v1948_v15 = vpack.c.bf16 %v1510_v63, %v1509_v59 }
 0x447   : > { %v1323_v54 = vsub.f32 %v1283_v39, %v1315_v20  ;;  %v1347_v61 = vadd.f32 %v1339_v41, %v1331_v40 }
 0x448   : > { %v1284_v48 = vmul.f32 %v1268_v46, %v1228_v42  ;;  %v1316_v50 = vmul.f32 %v1300_v24, %v1252_v43  ;;  %v1332_v51 = vmul.f32 %v1300_v24, %v1228_v42  ;;  %v1340_v52 = vmul.f32 %v1268_v46, %v1252_v43 }
 0x449   : > { %v1372_v49 = vrot.slane %v1323_v54, 2  ;;  %v1398_v47 = vrot.slane %v1347_v61, 2 }
 0x44a   : > { %v1324_v57 = vsub.f32 %v1284_v48, %v1316_v50  ;;  %v1348_v60 = vadd.f32 %v1340_v52, %v1332_v51 }
 0x44b   : > { %v1374_v53 = vsel %vm1373_vm7, %v1372_v49, %v1371_v9  ;;  %v1399_v56 = vsel %vm1373_vm7, %v1398_v47, %v1397_v0 }
 0x44c   : > { %v1375_v62 = vrot.slane %v1324_v57, 1  ;;  %v1400_v2 = vrot.slane %v1348_v60, 1 }
 0x44e   : > { %v1377_v30 = vsel %vm1376_vm9, %v1375_v62, %v1374_v53  ;;  %v1401_v32 = vsel %vm1376_vm9, %v1400_v2, %v1399_v56 }
 0x44f   : > { %v1403_v3 = vmul.f32 %v1691_v58, %v1401_v32  ;;  %v1405_v5 = vmul.f32 %v1690_v55, %v1401_v32  ;;  %v1406_v4 = vmul.f32 %v1691_v58, %v1377_v30  ;;  %v1379_v11 = vmul.f32 %v1690_v55, %v1377_v30 }
 0x451   : > { %v1407_v13 = vadd.f32 %v1406_v4, %v1405_v5  ;;  %v1404_v44 = vsub.f32 %v1379_v11, %v1403_v3 }
 0x453   : > { %1409 = vrot.lane.b32.xlu0 %v1407_v13, %s2075_s29  ;;  %s1669_s29 = sshll.u32 %s405_s30, 3 }
 0x454   : > { %s407_s16 = scalar_lea.vmem [#allocation2], %s1669_s29  ;;  %s2014_s29 = sshll.u32 %s2079_s25, 4  ;;  %s2015_s29 = int_to_ptr.vmem [resolvable:$false] %s2014_s29 }
 0x455   : > { %s1606_s17 = sshll.u32 %s407_s16, 4  ;;  %s2016_s28 = scalar_lea.vmem %s2015_s29, 256  ;;  %s2553_s17 = int_to_ptr.vmem [resolvable:$true] %s1606_s17 }
 0x456   : > { %s2010_s19 = scalar_lea.vmem %s2553_s17, 128  ;;  %p2017_p0 = scmp.lt.s32.totalorder %s2553_s17, %s2015_s29 }
 0x457   : > { %p2011_p11 = scmp.ne.s32.totalorder %s2553_s17, %s2010_s19  ;;  %p2018_p1 = scmp.lt.s32.totalorder %s2016_s28, %s2010_s19 }
 0x459   : > { %p2012_p12 = pnand %p2011_p11, %p2183_p5  ;;  %p2019_p2 = por %p2018_p1, %p2017_p0 }
 0x45b   : > { %p2013_p13 = pneg %p2012_p12 }
 0x45d   : > { %p2020_p3 = pnand %p2019_p2, %p2013_p13 }
 0x4c5   : > { %v1410_v19 = vpop.permute.xlu0 %1409 }
 0x4c6   : > { %v1412_v1 = vsel %vm565_vm1, %v1404_v44, %v1410_v19 }
 0x4c7   : > { %1861 = vmatmul.mubr.msk.f32.vlgmr.msra.gmra.mrb[8].mxu1 %vm1428_vm10, %v1412_v1 }
 0x4c8   : > { %1940 = vmatpush3.bf16.msra.mxu1 %v1939_v45  ;;  %1879 = vmatprep.mubr.msk.f32.mxu1 %vm2077_vm8, %v2078_v26 }
 0x4c9   : > { %1941 = vmatprep.subr.bf16.mxu1 %v2076_v16 }
 0x4cc   : > { %1943 = vmatpush3.bf16.msra.mxu1 %v1942_v23 }
 0x4cd   : > { %1944 = vmatprep.subr.bf16.mxu1 %v2076_v16 }
 0x4d0   : > { %1946 = vmatpush3.bf16.msra.mxu1 %v1945_v28 }
 0x4d1   : > { %1947 = vmatprep.subr.bf16.mxu1 %v2076_v16  ;;  %v1694_v16 = vld [vmem:[%s2604_s11] ss:$0 sm:$0xff] }
 0x4d4   : > { %1949 = vmatpush3.bf16.msra.mxu1 %v1948_v15 }
 0x59a   : > { %v1498_v29 = vpop.f32.mrb[8].mxu1 }
 0x59b   : > { %v1499_v6 = vadd.f32 %v1692_v10, %v1498_v29  ;;  %v1862_v12 = vpop.f32.mrb[9].mxu1 }
 0x59d   : > { %v1502_v14 = vmax.f32 %v1499_v6, 0.0 }
 0x59f   : > { %1880 = vmatmul.mubr.msk.f32.vlgmr.msra.gmra.mrb[10].mxu1 %vm1428_vm10, %v1502_v14 }
 0x672   : > { %v1587_v33 = vpop.f32.mrb[10].mxu1 }
 0x673   : > { %v1588_v7 = vadd.f32 %v1694_v16, %v1587_v33  ;;  %v1881_v9 = vpop.f32.mrb[11].mxu1 }
 0x675   : > { %1591 = vst [vmem:[%s407_s16] sm:$0xff] %v1588_v7 }
 0x676   : > { %2023 = shalt.err (!%p2020_p3)
}
 0x677   : > { %s2024_s30 = scalar_lea.hbm %s2551_s26, 128  ;;  %s2028_s18 = scalar_lea.hbm %s2605_s12, 256 }
 0x678   : > { %p2025_p4 = scmp.ne.s32.totalorder %s2551_s26, %s2024_s30  ;;  %p2029_p9 = scmp.lt.u32.totalorder %s2551_s26, %s2605_s12 }
 0x679   : > { %p2030_p10 = scmp.lt.u32.totalorder %s2028_s18, %s2024_s30  ;;  %p2032_p12 = scmp.lt.u32.totalorder %s2024_s30, %s2551_s26 }
 0x67a   : > { %p2026_p7 = pnand %p2025_p4, %p2183_p5 }
 0x67b   : > { %p2031_p11 = por %p2030_p10, %p2029_p9 }
 0x67c   : > { %p2027_p8 = pneg %p2026_p7 }
 0x67d   : > { %p2033_p13 = por %p2032_p12, %p2031_p11 }
 0x67f   : > { %p2034_p0 = pnand %p2033_p13, %p2027_p8 }
 0x681   : > { %2037 = shalt.err (!%p2034_p0)
}
 0x682   : > { %1950 = dma.vmem_to_hbm [thread:$0]  (%p2183_p5), %s2553_s17, 128, %s2551_s26, %s1593_s23  }
 0x683 PF: > { %p1956_p1 = scmp.ge.s32.totalorder %s2072_s24, 2  ;;  %s1618_s19 = sand.u32 1, %s2060_s21  }
 0x684   : > { %s1619_s29 = scalar_lea.sflag [#allocation3], %s1618_s19 }
 0x685   : > { %p1953_p2 = pnand %p1956_p1, %p2187_p6 }
 0x687   : > { %2055 = dma.done.wait (!%p1953_p2), %s1619_s29, 128  }
 0x688   : > { %2057 = vsyncadd (!%p1953_p2), %s1619_s29, 4294967168  ;;  %s2611_s28 = sld [smem:[#allocation5_spill]]  ;;  %s2612_s23 = sld [smem:[#allocation6_spill]] }
 0x689   : > { %p22_p3 = scmp.ge.s32.totalorder %s2170_s27, 4   ;;  %s2613_s21 = smov %s2064_s22 }
 0x68a   : > { %s2615_s24 = smov %s2170_s27 }
 0x68b   :  { %24 = sbr.rel (!%p22_p3) target bundleno = 3 (0x3), region = 103 }
 0x68e   : > { %s2614_s22 = smov %s2611_s28 }
 0x692   :  { %1624 = vsyncpa [#allocation3], 1 }
 0x693   :  { %1626 = vsyncpa [#allocation3 + $0x1], 1 }

</bundles_post_ra>
